<compile_context>
chip_gen: v7x
topology: tpu7x:2x2x1
jax: 0.10.0
libtpu: 0.0.40
codegen_flags: <defaults>
</compile_context>

<pallas_src>
import numpy as np
import jax
import jax.numpy as jnp
from jax import lax
from jax.experimental import pallas as pl
from jax.experimental.pallas import tpu as pltpu

# ---------------- problem sizes (small, deterministic) ----------------
B = 2            # batch
N = 16           # tokens (z_H*z_W + x_H*x_W)
C = 32           # embedding dim
NUM_HEADS = 4
assert C % NUM_HEADS == 0, "dim must be divisible by num_heads"
HEAD_DIM = C // NUM_HEADS
SCALE = HEAD_DIM ** (-0.5)
SR_RATIO = 1     # module default; see TODO above

BN = B * N                 # 32  (folded batch*token rows)
HBN = NUM_HEADS * BN       # 128 (head-stacked rows)

# row offsets inside the packed parameter slab (all 8-aligned)
POSB_ROW = 0               # (BN, 3C) pre-tiled positional bias
WQKV_ROW = BN              # (C, 3C)  packed Wq*scale | Wk | Wv
WP_ROW = BN + C            # (C, C)   proj weight (cols 0:C)
BP_ROW = BN + 2 * C        # (1, C)   proj bias   (cols 0:C)
PARAM_ROWS = BN + 2 * C + 8
MASK_W = max(C, BN)        # packed mask slab width


def _attn_kernel(x_ref, params_ref, masks_ref, out_ref):
    f32 = jnp.float32
    x = x_ref[...].astype(f32)                                      # (BN, C)

    # ---- static slices of the packed constant operands (no in-kernel masks) ----
    posb = params_ref[POSB_ROW:POSB_ROW + BN, :]                    # (BN, 3C)
    wqkv = params_ref[WQKV_ROW:WQKV_ROW + C, :]                     # (C, 3C)
    wp = params_ref[WP_ROW:WP_ROW + C, 0:C]                         # (C, C)
    bp = params_ref[BP_ROW:BP_ROW + 1, 0:C]                         # (1, C)
    head_mask = masks_ref[0:HBN, 0:C]                               # (HBN, C)  0/1 f32
    batch_bias = masks_ref[HBN:2 * HBN, 0:BN]                       # (HBN, BN) 0/-1e30 f32

    # ---- fused q/k/v projection (+ hoisted pos bias; scale pre-folded into Wq) ----
    qkv = jnp.dot(x, wqkv, preferred_element_type=f32) + posb       # (BN, 3C)
    q = qkv[:, 0 * C:1 * C]                                         # (BN, C) already * SCALE
    k = qkv[:, 1 * C:2 * C]                                         # (BN, C)
    v = qkv[:, 2 * C:3 * C]                                         # (BN, C)

    # ---- head-stacked scores: rows ordered (head, batch, token); one wide matmul ----
    # sublane copies + one vmul against the 0/1 head mask (no select).
    # (jnp.tile is equivalent; concatenate is the verified-lowering sublane-copy path.)
    q_hs = jnp.concatenate([q] * NUM_HEADS, axis=0) * head_mask     # (HBN, C)
    scores = lax.dot_general(q_hs, k, (((1,), (1,)), ((), ())),
                             preferred_element_type=f32)            # (HBN, BN)
    scores = scores + batch_bias                                    # additive batch mask

    # ---- single stacked softmax over keys (attn_drop p=0 -> identity) ----
    scores = scores - jnp.max(scores, axis=-1, keepdims=True)
    p = jnp.exp(scores)
    p = p * pl.reciprocal(jnp.sum(p, axis=-1, keepdims=True), approx=True)

    # ---- context; the head "concat" = summing disjointly-masked row blocks ----
    ctx_hs = jnp.dot(p, v, preferred_element_type=f32) * head_mask  # (HBN, C)
    ctx = ctx_hs[0:BN, :]
    for h in range(1, NUM_HEADS):
        ctx = ctx + ctx_hs[h * BN:(h + 1) * BN, :]                  # (BN, C)

    # ---- output projection + bias (proj_drop p=0 -> identity), one lane-dense store ----
    out = jnp.dot(ctx, wp, preferred_element_type=f32) + bp
    out_ref[...] = out.astype(out_ref.dtype)


def prepare_params(wq_t, wk_t, wv_t, wp_t, bp, merged_q_pos, merged_k_pos):
    """One-time packing of every static operand (weights, positions, masks).

    Run once at parameter-load time; the per-call forward only touches `merged`.
    """
    f32 = jnp.float32
    # q/k/v weights packed to (C, 3C), softmax scale folded into Wq columns.
    wqkv = jnp.concatenate([wq_t.astype(f32) * SCALE,
                            wk_t.astype(f32),
                            wv_t.astype(f32)], axis=1)                      # (C, 3C)
    # Hoisted positional-encoding projections, pre-tiled over batch.
    pos_bias = jnp.concatenate([(merged_q_pos[0].astype(f32) @ wq_t) * SCALE,
                                merged_k_pos[0].astype(f32) @ wk_t,
                                jnp.zeros((N, C), f32)], axis=1)            # (N, 3C)
    pos_bias = jnp.tile(pos_bias, (B, 1))                                   # (BN, 3C)
    # proj weight / bias padded into the same 3C-wide slab.
    wp_pad = jnp.zeros((C, 3 * C), f32).at[:, 0:C].set(wp_t.astype(f32))
    bp_pad = jnp.zeros((8, 3 * C), f32).at[0, 0:C].set(bp.reshape(C).astype(f32))
    params = jnp.concatenate([pos_bias, wqkv, wp_pad, bp_pad], axis=0)      # (104, 96)
    assert params.shape == (PARAM_ROWS, 3 * C)

    # Compile-time-constant masks for fixed (B, N, H); rows ordered (head, batch, token).
    rows = np.arange(HBN)
    head_of_row = rows // BN
    batch_of_row = (rows // N) % B
    head_mask = (head_of_row[:, None] == (np.arange(C) // HEAD_DIM)[None, :])
    batch_ok = (batch_of_row[:, None] == (np.arange(BN) // N)[None, :])
    head_mask_p = np.zeros((HBN, MASK_W), np.float32)
    head_mask_p[:, :C] = head_mask.astype(np.float32)
    batch_bias_p = np.zeros((HBN, MASK_W), np.float32)
    batch_bias_p[:, :BN] = np.where(batch_ok, 0.0, -1e30).astype(np.float32)
    masks = jnp.asarray(np.concatenate([head_mask_p, batch_bias_p], axis=0))  # (256, MASK_W)
    return params, masks


@jax.jit
def pvt_merged_self_attention(merged, params, masks):
    """merged: (B, N, C); params/masks from prepare_params()."""
    x2d = merged.reshape(BN, C)
    out2d = pl.pallas_call(
        _attn_kernel,
        out_shape=jax.ShapeDtypeStruct((BN, C), merged.dtype),
        # single invocation, whole-array VMEM operands: no grid, no pipeline scaffolding
        in_specs=[pl.BlockSpec(memory_space=pltpu.MemorySpace.VMEM)] * 3,
        out_specs=pl.BlockSpec(memory_space=pltpu.MemorySpace.VMEM),
    )(x2d, params, masks)
    return out2d.reshape(B, N, C)


def _reference(merged, q_pos, k_pos, wq_t, wk_t, wv_t, wp_t, bp):
    """Pure-JAX reference mirroring the PyTorch forward (sr_ratio=1)."""
    q = (merged + q_pos) @ wq_t
    k = (merged + k_pos) @ wk_t
    v = merged @ wv_t

    def split_heads(t):                                # (B, H, N, D)
        return t.reshape(B, N, NUM_HEADS, HEAD_DIM).transpose(0, 2, 1, 3)

    qh, kh, vh = split_heads(q), split_heads(k), split_heads(v)
    attn = jnp.einsum("bhnd,bhmd->bhnm", qh, kh) * SCALE
    attn = jax.nn.softmax(attn, axis=-1)
    out = jnp.einsum("bhnm,bhmd->bhnd", attn, vh)
    out = out.transpose(0, 2, 1, 3).reshape(B, N, C)
    return out @ wp_t + bp


if __name__ == "__main__":
    key = jax.random.PRNGKey(0)
    k0, k1, k2, k3, k4, k5, k6, k7 = jax.random.split(key, 8)

    # inputs
    merged = jax.random.normal(k0, (B, N, C), dtype=jnp.float32)
    merged_q_pos = jax.random.normal(k1, (1, N, C), dtype=jnp.float32)
    merged_k_pos = jax.random.normal(k2, (1, N, C), dtype=jnp.float32)

    # parameters (PyTorch Linear weight is (out, in) -> pre-transposed to (in, out))
    std = 0.02
    wq_t = (std * jax.random.normal(k3, (C, C), dtype=jnp.float32)).T
    wk_t = (std * jax.random.normal(k4, (C, C), dtype=jnp.float32)).T
    wv_t = (std * jax.random.normal(k5, (C, C), dtype=jnp.float32)).T
    wp_t = (std * jax.random.normal(k6, (C, C), dtype=jnp.float32)).T
    bp = std * jax.random.normal(k7, (1, C), dtype=jnp.float32)

    # one-time static packing (hoisted out of the hot path)
    params, masks = prepare_params(wq_t, wk_t, wv_t, wp_t, bp,
                                   merged_q_pos, merged_k_pos)
    params, masks = jax.block_until_ready((params, masks))

    out = pvt_merged_self_attention(merged, params, masks)
    out = jax.block_until_ready(out)

    ref = _reference(merged, merged_q_pos, merged_k_pos,
                     wq_t, wk_t, wv_t, wp_t, bp)
    assert out.shape == (B, N, C)
    assert jnp.allclose(out, ref, atol=2e-3, rtol=2e-3), "mismatch vs reference"

    print("KERNEL_OK")
</pallas_src>

<mosaic_0001>
module attributes {stable_mosaic.version = 11 : i64} {
  func.func @_attn_kernel(%arg0: memref<32x32xf32, #tpu.memory_space<vmem>>, %arg1: memref<104x96xf32, #tpu.memory_space<vmem>>, %arg2: memref<256x32xf32, #tpu.memory_space<vmem>>, %arg3: memref<32x32xf32, #tpu.memory_space<vmem>>) attributes {dimension_semantics = [], scalar_prefetch = 0 : i64, scratch_operands = 0 : i64, tpu.core_type = #tpu.core_type<tc>} {
    %c0 = arith.constant 0 : index
    %c0_0 = arith.constant 0 : index
    %0 = vector.load %arg0[%c0, %c0_0] : memref<32x32xf32, #tpu.memory_space<vmem>>, vector<32x32xf32>
    %c0_1 = arith.constant 0 : index
    %c0_2 = arith.constant 0 : index
    %1 = vector.load %arg1[%c0_1, %c0_2] : memref<104x96xf32, #tpu.memory_space<vmem>>, vector<32x96xf32>
    %c32 = arith.constant 32 : index
    %c0_3 = arith.constant 0 : index
    %2 = vector.load %arg1[%c32, %c0_3] : memref<104x96xf32, #tpu.memory_space<vmem>>, vector<32x96xf32>
    %c64 = arith.constant 64 : index
    %c0_4 = arith.constant 0 : index
    %3 = vector.load %arg1[%c64, %c0_4] : memref<104x96xf32, #tpu.memory_space<vmem>>, vector<32x32xf32>
    %c96 = arith.constant 96 : index
    %c0_5 = arith.constant 0 : index
    %4 = vector.load %arg1[%c96, %c0_5] : memref<104x96xf32, #tpu.memory_space<vmem>>, vector<1x32xf32>
    %c0_6 = arith.constant 0 : index
    %c0_7 = arith.constant 0 : index
    %5 = vector.load %arg2[%c0_6, %c0_7] : memref<256x32xf32, #tpu.memory_space<vmem>>, vector<128x32xf32>
    %c128 = arith.constant 128 : index
    %c0_8 = arith.constant 0 : index
    %6 = vector.load %arg2[%c128, %c0_8] : memref<256x32xf32, #tpu.memory_space<vmem>>, vector<128x32xf32>
    %cst = arith.constant dense<0.000000e+00> : vector<32x96xf32>
    %7 = tpu.matmul %0, %2, %cst {dimension_numbers = #tpu.dot_dimension_numbers<[1], [0], [0], [1], [0, 0, 1, 1], [], []>} : vector<32x32xf32>, vector<32x96xf32>, vector<32x96xf32> -> vector<32x96xf32>
    %8 = arith.addf %7, %1 : vector<32x96xf32>
    %9 = vector.extract_strided_slice %8 {offsets = [0, 0], sizes = [32, 32], strides = [1, 1]} : vector<32x96xf32> to vector<32x32xf32>
    %10 = vector.extract_strided_slice %8 {offsets = [0, 32], sizes = [32, 32], strides = [1, 1]} : vector<32x96xf32> to vector<32x32xf32>
    %11 = vector.extract_strided_slice %8 {offsets = [0, 64], sizes = [32, 32], strides = [1, 1]} : vector<32x96xf32> to vector<32x32xf32>
    %12 = tpu.concatenate %9, %9, %9, %9 in 0 : vector<32x32xf32>, vector<32x32xf32>, vector<32x32xf32>, vector<32x32xf32> -> vector<128x32xf32>
    %13 = arith.mulf %12, %5 : vector<128x32xf32>
    %cst_9 = arith.constant dense<0.000000e+00> : vector<128x32xf32>
    %14 = tpu.matmul %13, %10, %cst_9 {dimension_numbers = #tpu.dot_dimension_numbers<[1], [1], [0], [0], [0, 0, 1, 0], [], []>} : vector<128x32xf32>, vector<32x32xf32>, vector<128x32xf32> -> vector<128x32xf32>
    %15 = arith.addf %14, %6 : vector<128x32xf32>
    %cst_10 = arith.constant dense<0xFF800000> : vector<128xf32>
    %16 = vector.multi_reduction <maximumf>, %15, %cst_10 [1] : vector<128x32xf32> to vector<128xf32>
    %17 = vector.shape_cast %16 : vector<128xf32> to vector<128x1xf32>
    %18 = vector.broadcast %17 : vector<128x1xf32> to vector<128x32xf32>
    %19 = arith.subf %15, %18 : vector<128x32xf32>
    %20 = math.exp %19 : vector<128x32xf32>
    %cst_11 = arith.constant dense<0.000000e+00> : vector<128xf32>
    %21 = vector.multi_reduction <add>, %20, %cst_11 [1] : vector<128x32xf32> to vector<128xf32>
    %22 = vector.shape_cast %21 : vector<128xf32> to vector<128x1xf32>
    %23 = tpu.reciprocal %22 {approx = true} : vector<128x1xf32> -> vector<128x1xf32>
    %24 = vector.broadcast %23 : vector<128x1xf32> to vector<128x32xf32>
    %25 = arith.mulf %20, %24 : vector<128x32xf32>
    %cst_12 = arith.constant dense<0.000000e+00> : vector<128x32xf32>
    %26 = tpu.matmul %25, %11, %cst_12 {dimension_numbers = #tpu.dot_dimension_numbers<[1], [0], [0], [1], [0, 0, 1, 1], [], []>} : vector<128x32xf32>, vector<32x32xf32>, vector<128x32xf32> -> vector<128x32xf32>
    %27 = arith.mulf %26, %5 : vector<128x32xf32>
    %28 = vector.extract_strided_slice %27 {offsets = [0, 0], sizes = [32, 32], strides = [1, 1]} : vector<128x32xf32> to vector<32x32xf32>
    %29 = vector.extract_strided_slice %27 {offsets = [32, 0], sizes = [32, 32], strides = [1, 1]} : vector<128x32xf32> to vector<32x32xf32>
    %30 = arith.addf %28, %29 : vector<32x32xf32>
    %31 = vector.extract_strided_slice %27 {offsets = [64, 0], sizes = [32, 32], strides = [1, 1]} : vector<128x32xf32> to vector<32x32xf32>
    %32 = arith.addf %30, %31 : vector<32x32xf32>
    %33 = vector.extract_strided_slice %27 {offsets = [96, 0], sizes = [32, 32], strides = [1, 1]} : vector<128x32xf32> to vector<32x32xf32>
    %34 = arith.addf %32, %33 : vector<32x32xf32>
    %cst_13 = arith.constant dense<0.000000e+00> : vector<32x32xf32>
    %35 = tpu.matmul %34, %3, %cst_13 {dimension_numbers = #tpu.dot_dimension_numbers<[1], [0], [0], [1], [0, 0, 1, 1], [], []>} : vector<32x32xf32>, vector<32x32xf32>, vector<32x32xf32> -> vector<32x32xf32>
    %36 = vector.broadcast %4 : vector<1x32xf32> to vector<32x32xf32>
    %37 = arith.addf %35, %36 : vector<32x32xf32>
    %c0_14 = arith.constant 0 : index
    %c0_15 = arith.constant 0 : index
    %38 = vector.load %arg3[%c0_14, %c0_15] : memref<32x32xf32, #tpu.memory_space<vmem>>, vector<32x32xf32>
    tpu.vector_store %arg3[%c0_14, %c0_15], %37 {strides = array<i32>} : memref<32x32xf32, #tpu.memory_space<vmem>>, vector<32x32xf32>,
    return
  }
}

</mosaic_0001>

<bundles_post_ra>
// kernel: pvt_merged_self_attention.1
= control target key start
LH: loop header
LB: loop body
LE: loop exit
PB: predicated region body
PF: predicated region fallthrough
CT: control target
= control target key end

     0   :  { %vm64_vm0 = vcmask 261120   ;;  %s1743_s0 = inlined_call_operand.vmem [shape: f32[32,32], index: 0, kind: input, shape index: {}]   ;;  %s1744_s1 = inlined_call_operand.vmem [shape: f32[104,96], index: 1, kind: input, shape index: {}]   ;;  %s1745_s2 = inlined_call_operand.vmem [shape: f32[256,32], index: 2, kind: input, shape index: {}]   ;;  %s1746_s3 = inlined_call_operand.hbm [shape: f32[32,32], index: 3, kind: output, shape index: {}]  }
   0x1   :  { %v23_v0 = vld [vmem:[%s1744_s1 + $0x20] sm:$0xff]  ;;  %v24_v1 = vld [vmem:[%s1744_s1 + $0x28] sm:$0xff]  ;;  %v25_v2 = vld [vmem:[%s1744_s1 + $0x30] sm:$0xff] }
   0x2   :  { %v1114_v3 = vpack.c.bf16 %v24_v1, %v23_v0  ;;  %v26_v4 = vld [vmem:[%s1744_s1 + $0x38] sm:$0xff]  ;;  %v15_v5 = vld [vmem:[%s1743_s0] sm:$0xff] }
   0x3   :  { %v1118_v6 = vpack.c.bf16 %v26_v4, %v25_v2  ;;  %1030 = vmatprep.mubr.msk.f32.mxu0 %vm64_vm0, %v15_v5 }
   0x4   :  { %1115 = vmatprep.subr.bf16.mxu0 %v1114_v3 }
   0x5   :  { %8 = vsyncpa [#allocation3], 0  ;;  %1117 = vmatpush3.bf16.msra.mxu0 %v1114_v3  ;;  %v16_v7 = vld [vmem:[%s1743_s0 + $0x8] sm:$0xff]  ;;  %v17_v8 = vld [vmem:[%s1743_s0 + $0x10] sm:$0xff]  ;;  %s1267_s10 = smov 96   ;;  %s1269_s27 = smov [#allocation2]  }
   0x6   :  { %1119 = vmatprep.subr.bf16.mxu0 %v1118_v6  ;;  %v18_v9 = vld [vmem:[%s1743_s0 + $0x18] sm:$0xff]  ;;  %v20_v10 = vld [vmem:[%s1744_s1 + $0x8] sm:$0xff]  ;;  %v19_v11 = vld [vmem:[%s1744_s1] sm:$0xff]  ;;  %s910_s28 = sshll.u32 %s1269_s27, 4  ;;  %s911_s28 = int_to_ptr.vmem [resolvable:$true] %s910_s28 }
   0x7   :  { %v1331_v15 = vld [vmem:[%s1745_s2] sm:$0xff]  ;;  %v22_v17 = vld [vmem:[%s1744_s1 + $0x18] sm:$0xff]  ;;  %v21_v18 = vld [vmem:[%s1744_s1 + $0x10] sm:$0xff]  ;;  %p1248_p1 = scmp.lt.s32.totalorder %s911_s28, %s911_s28 }
   0x8   :  { %vm1123_vm1 = vmpackc.low %vm64_vm0, %vm64_vm0  ;;  %v1356_v34 = vld [vmem:[%s1745_s2 + $0x8] sm:$0xff]  ;;  %v1361_v35 = vld [vmem:[%s1745_s2 + $0x10] sm:$0xff] }
   0x9   :  { %1121 = vmatpush3.bf16.msra.mxu0 %v1118_v6  ;;  %v1369_v38 = vld [vmem:[%s1745_s2 + $0x18] sm:$0xff]  ;;  %v1375_v39 = vld [vmem:[%s1745_s2 + $0x20] sm:$0xff]  ;;  %v1384_v42 = vld [vmem:[%s1745_s2 + $0x28] sm:$0xff] }
   0xa   :  { %v1390_v43 = vld [vmem:[%s1745_s2 + $0x30] sm:$0xff]  ;;  %v1399_v46 = vld [vmem:[%s1745_s2 + $0x38] sm:$0xff]  ;;  %v1405_v47 = vld [vmem:[%s1745_s2 + $0x40] sm:$0xff] }
   0xb   :  { %v1414_v50 = vld [vmem:[%s1745_s2 + $0x48] sm:$0xff]  ;;  %v1420_v51 = vld [vmem:[%s1745_s2 + $0x50] sm:$0xff]  ;;  %v1429_v54 = vld [vmem:[%s1745_s2 + $0x58] sm:$0xff] }
   0xc   :  { %1031 = vmatmul.mubr.msk.f32.vlgmr.msra.gmra.mrb[0].mxu0 %vm64_vm0, %v16_v7  ;;  %v1435_v55 = vld [vmem:[%s1745_s2 + $0x60] sm:$0xff]  ;;  %v1444_v58 = vld [vmem:[%s1745_s2 + $0x68] sm:$0xff]  ;;  %v1450_v59 = vld [vmem:[%s1745_s2 + $0x70] sm:$0xff] }
   0xd   :  { %1033 = vmatprep.mubr.msk.f32.mxu0 %vm64_vm0, %v17_v8  ;;  %v1459_v62 = vld [vmem:[%s1745_s2 + $0x78] sm:$0xff]  ;;  %v49_v0 = vld [vmem:[%s1745_s2 + $0x88] sm:$0xff]  ;;  %v48_v2 = vld [vmem:[%s1745_s2 + $0x80] sm:$0xff] }
   0xe   :  { %v50_v7 = vld [vmem:[%s1745_s2 + $0x90] sm:$0xff]  ;;  %v51_v8 = vld [vmem:[%s1745_s2 + $0x98] sm:$0xff] }
  0x10   :  { %1034 = vmatmul.mubr.msk.f32.gmra.mrb[2].mxu0 %vm64_vm0, %v18_v9 }
  0xdf   :  { %v1032_v12 = vpop.f32.mrb[0].mxu0 }
  0xe0   :  { %v1326_v13 = vadd.f32 %v1032_v12, %v20_v10  ;;  %v143_v14 = vpop.f32.mrb[1].mxu0 }
  0xe1   :  { %v144_v16 = vadd.f32 %v143_v14, %v19_v11  ;;  %v53_v14 = vld [vmem:[%s1745_s2 + $0xa8] sm:$0xff] }
  0xe2   :  { %v163_v36 = vmul.f32 %v1326_v13, %v1356_v34  ;;  %v167_v44 = vmul.f32 %v1326_v13, %v1384_v42  ;;  %v171_v52 = vmul.f32 %v1326_v13, %v1414_v50  ;;  %v175_v60 = vmul.f32 %v1326_v13, %v1444_v58 }
  0xe3   :  { %v1340_v19 = vpack.i.bf16 %v1326_v13, %v144_v16  ;;  %v162_v20 = vmul.f32 %v144_v16, %v1331_v15  ;;  %v1035_v21 = vpop.f32.mrb[2].mxu0  ;;  %v166_v41 = vmul.f32 %v144_v16, %v1375_v39  ;;  %v170_v49 = vmul.f32 %v144_v16, %v1405_v47 }
  0xe4   :  { %v1343_v22 = vadd.f32 %v1035_v21, %v22_v17  ;;  %v153_v23 = vpop.f32.mrb[3].mxu0  ;;  %v174_v57 = vmul.f32 %v144_v16, %v1435_v55 }
  0xe5   :  { %1160 = vrot.lane.b32.xlu0 %v1340_v19, %s1267_s10  ;;  %1044 = vmatprep.mubr.msk.f32.mxu1 %vm64_vm0, %v162_v20  ;;  %v154_v24 = vadd.f32 %v153_v23, %v21_v18 }
  0xe6   :  { %v165_v40 = vmul.f32 %v1343_v22, %v1369_v38  ;;  %v169_v48 = vmul.f32 %v1343_v22, %v1399_v46  ;;  %v173_v56 = vmul.f32 %v1343_v22, %v1429_v54  ;;  %v177_v63 = vmul.f32 %v1343_v22, %v1459_v62 }
  0xe7   :  { %v1348_v25 = vpack.i.bf16 %v1343_v22, %v154_v24  ;;  %v164_v37 = vmul.f32 %v154_v24, %v1361_v35  ;;  %v168_v45 = vmul.f32 %v154_v24, %v1390_v43  ;;  %v172_v53 = vmul.f32 %v154_v24, %v1420_v51  ;;  %v52_v22 = vld [vmem:[%s1745_s2 + $0xa0] sm:$0xff] }
  0xe8   :  { %v176_v61 = vmul.f32 %v154_v24, %v1450_v59 }
  0xe9   :  { %1165 = vrot.lane.b32.xlu0 %v1348_v25, %s1267_s10 }
 0x157   :  { %v1161_v26 = vpop.permute.xlu0 %1160 }
 0x158   :  { %v1163_v27 = vunpack.i.h.bf16 %v1161_v26  ;;  %v1162_v28 = vunpack.i.l.bf16 %v1161_v26 }
 0x15a   :  { %v1122_v29 = vpack.c.bf16 %v1163_v27, %v1162_v28  ;;  %v55_v28 = vld [vmem:[%s1745_s2 + $0xb8] sm:$0xff] }
 0x15b   :  { %v1166_v30 = vpop.permute.xlu0 %1165 }
 0x15c   :  { %1124 = vmatprep.subr.msk.bf16.mxu1 %vm1123_vm1, %v1122_v29  ;;  %v1168_v31 = vunpack.i.h.bf16 %v1166_v30  ;;  %v1167_v32 = vunpack.i.l.bf16 %v1166_v30 }
 0x15d   :  { %1127 = vmatpush3.bf16.xpose.msk.msra.mxu1 %vm1123_vm1, %v1122_v29 }
 0x15e   :  { %v1128_v33 = vpack.c.bf16 %v1168_v31, %v1167_v32  ;;  %v59_v31 = vld [vmem:[%s1745_s2 + $0xd8] sm:$0xff] }
 0x160   :  { %1130 = vmatprep.subr.msk.bf16.mxu1 %vm1123_vm1, %v1128_v33 }
 0x165   :  { %1133 = vmatpush3.bf16.xpose.msk.msra.mxu1 %vm1123_vm1, %v1128_v33 }
 0x16c   :  { %1045 = vmatmul.mubr.msk.f32.vlgmr.msra.gmra.mrb[0].mxu1 %vm64_vm0, %v163_v36  ;;  %v54_v36 = vld [vmem:[%s1745_s2 + $0xb0] sm:$0xff] }
 0x16d   :  { %1047 = vmatprep.mubr.msk.f32.mxu1 %vm64_vm0, %v164_v37 }
 0x170   :  { %1048 = vmatmul.mubr.msk.f32.gmra.mrb[2].mxu1 %vm64_vm0, %v165_v40 }
 0x171   :  { %1050 = vmatprep.mubr.msk.f32.mxu1 %vm64_vm0, %v166_v41 }
 0x174   :  { %1051 = vmatmul.mubr.msk.f32.gmra.mrb[4].mxu1 %vm64_vm0, %v167_v44  ;;  %v61_v44 = vld [vmem:[%s1745_s2 + $0xe8] sm:$0xff] }
 0x175   :  { %1053 = vmatprep.mubr.msk.f32.mxu1 %vm64_vm0, %v168_v45 }
 0x178   :  { %1054 = vmatmul.mubr.msk.f32.gmra.mrb[6].mxu1 %vm64_vm0, %v169_v48 }
 0x179   :  { %1056 = vmatprep.mubr.msk.f32.mxu1 %vm64_vm0, %v170_v49 }
 0x17c   :  { %1057 = vmatmul.mubr.msk.f32.gmra.mrb[8].mxu1 %vm64_vm0, %v171_v52  ;;  %v57_v52 = vld [vmem:[%s1745_s2 + $0xc8] sm:$0xff] }
 0x17d   :  { %1059 = vmatprep.mubr.msk.f32.mxu1 %vm64_vm0, %v172_v53 }
 0x180   :  { %1060 = vmatmul.mubr.msk.f32.gmra.mrb[10].mxu1 %vm64_vm0, %v173_v56 }
 0x181   :  { %1062 = vmatprep.mubr.msk.f32.mxu1 %vm64_vm0, %v174_v57 }
 0x184   :  { %1063 = vmatmul.mubr.msk.f32.gmra.mrb[12].mxu1 %vm64_vm0, %v175_v60  ;;  %v63_v60 = vld [vmem:[%s1745_s2 + $0xf8] sm:$0xff] }
 0x185   :  { %1065 = vmatprep.mubr.msk.f32.mxu1 %vm64_vm0, %v176_v61 }
 0x188   :  { %1066 = vmatmul.mubr.msk.f32.gmra.mrb[14].mxu1 %vm64_vm0, %v177_v63 }
 0x23f   :  { %v1046_v1 = vpop.f32.mrb[0].mxu1 }
 0x240   :  { %v1472_v3 = vadd.f32 %v1046_v1, %v49_v0  ;;  %v312_v4 = vpop.f32.mrb[1].mxu1  ;;  %v56_v1 = vld [vmem:[%s1745_s2 + $0xc0] sm:$0xff] }
 0x241   :  { %v1474_v5 = vadd.f32 %v312_v4, %v48_v2 }
 0x242   :  { %v394_v6 = vsel %vm64_vm0, %v1472_v3, -inf }
 0x243   :  { %395 = vmax.xlane.f32.xlu1 %v394_v6  ;;  %v1049_v9 = vpop.f32.mrb[2].mxu1  ;;  %v391_v13 = vsel %vm64_vm0, %v1474_v5, -inf }
 0x244   :  { %v322_v10 = vpop.f32.mrb[3].mxu1  ;;  %v1486_v12 = vadd.f32 %v1049_v9, %v51_v8 }
 0x245   :  { %v1484_v11 = vadd.f32 %v322_v10, %v50_v7  ;;  %v58_v10 = vld [vmem:[%s1745_s2 + $0xd0] sm:$0xff] }
 0x246   :  { %v400_v21 = vsel %vm64_vm0, %v1486_v12, -inf }
 0x247   :  { %v1052_v16 = vpop.f32.mrb[4].mxu1  ;;  %392 = vmax.xlane.f32.xlu1 %v391_v13  ;;  %v397_v17 = vsel %vm64_vm0, %v1484_v11, -inf }
 0x248   :  { %v332_v18 = vpop.f32.mrb[5].mxu1  ;;  %398 = vmax.xlane.f32.xlu0 %v397_v17  ;;  %v1495_v20 = vadd.f32 %v1052_v16, %v53_v14  ;;  %v60_v16 = vld [vmem:[%s1745_s2 + $0xe0] sm:$0xff] }
 0x249   :  { %v1502_v26 = vadd.f32 %v332_v18, %v52_v22 }
 0x24a   :  { %v406_v27 = vsel %vm64_vm0, %v1495_v20, -inf }
 0x24b   :  { %v1055_v23 = vpop.f32.mrb[6].mxu1  ;;  %401 = vmax.xlane.f32.xlu1 %v400_v21  ;;  %v403_v33 = vsel %vm64_vm0, %v1502_v26, -inf  ;;  %v62_v21 = vld [vmem:[%s1745_s2 + $0xf0] sm:$0xff]  ;;  %s1268_s2 = smov 64  }
 0x24c   :  { %v342_v24 = vpop.f32.mrb[7].mxu1  ;;  %v1512_v32 = vadd.f32 %v1055_v23, %v55_v28 }
 0x24d   :  { %v1524_v45 = vadd.f32 %v342_v24, %v54_v36 }
 0x24e   :  { %v412_v49 = vsel %vm64_vm0, %v1512_v32, -inf }
 0x24f   :  { %v1058_v29 = vpop.f32.mrb[8].mxu1  ;;  %407 = vmax.xlane.f32.xlu1 %v406_v27  ;;  %v409_v0 = vsel %vm64_vm0, %v1524_v45, -inf }
 0x250   :  { %v352_v30 = vpop.f32.mrb[9].mxu1  ;;  %v1538_v61 = vadd.f32 %v1058_v29, %v57_v52 }
 0x251   :  { %v1549_v7 = vadd.f32 %v352_v30, %v56_v1 }
 0x252   :  { %v418_v9 = vsel %vm64_vm0, %v1538_v61, -inf }
 0x253   :  { %v1061_v37 = vpop.f32.mrb[10].mxu1  ;;  %404 = vmax.xlane.f32.xlu1 %v403_v33  ;;  %v415_v14 = vsel %vm64_vm0, %v1549_v7, -inf }
 0x254   :  { %v1519_v40 = vadd.f32 %v1061_v37, %v59_v31  ;;  %v362_v41 = vpop.f32.mrb[11].mxu1 }
 0x255   :  { %v1558_v13 = vadd.f32 %v362_v41, %v58_v10 }
 0x256   :  { %v424_v48 = vsel %vm64_vm0, %v1519_v40, -inf }
 0x257   :  { %v1064_v53 = vpop.f32.mrb[12].mxu1  ;;  %425 = vmax.xlane.f32.xlu0 %v424_v48  ;;  %413 = vmax.xlane.f32.xlu1 %v412_v49  ;;  %v421_v18 = vsel %vm64_vm0, %v1558_v13, -inf }
 0x258   :  { %v1533_v56 = vadd.f32 %v1064_v53, %v61_v44  ;;  %v372_v57 = vpop.f32.mrb[13].mxu1 }
 0x259   :  { %v1565_v17 = vadd.f32 %v372_v57, %v60_v16 }
 0x25a   :  { %v430_v63 = vsel %vm64_vm0, %v1533_v56, -inf }
 0x25b   :  { %v1067_v2 = vpop.f32.mrb[14].mxu1  ;;  %431 = vmax.xlane.f32.xlu0 %v430_v63  ;;  %410 = vmax.xlane.f32.xlu1 %v409_v0  ;;  %v427_v23 = vsel %vm64_vm0, %v1565_v17, -inf }
 0x25c   :  { %v1547_v4 = vadd.f32 %v1067_v2, %v63_v60  ;;  %v382_v6 = vpop.f32.mrb[15].mxu1 }
 0x25d   :  { %v1572_v22 = vadd.f32 %v382_v6, %v62_v21 }
 0x25e   :  { %v436_v8 = vsel %vm64_vm0, %v1547_v4, -inf }
 0x25f   :  { %437 = vmax.xlane.f32.xlu0 %v436_v8  ;;  %419 = vmax.xlane.f32.xlu1 %v418_v9  ;;  %v433_v24 = vsel %vm64_vm0, %v1572_v22, -inf }
 0x263   :  { %416 = vmax.xlane.f32.xlu1 %v415_v14 }
 0x267   :  { %422 = vmax.xlane.f32.xlu1 %v421_v18 }
 0x26b   :  { %428 = vmax.xlane.f32.xlu1 %v427_v23 }
 0x26f   :  { %434 = vmax.xlane.f32.xlu1 %v433_v24 }
 0x2d0   :  { %v396_v27 = vpop.xlane.xlu1 %395 }
 0x2d1   :  { %v440_v28 = vsub.f32 %v1472_v3, %v396_v27 }
 0x2d3   :  { %v457_v29 = vmul.f32 1.442695, %v440_v28 }
 0x2d4   :  { %v393_v30 = vpop.xlane.xlu1 %392 }
 0x2d5   :  { %1179 = vpow2.f32 %v457_v29  ;;  %v439_v31 = vsub.f32 %v1474_v5, %v393_v30  ;;  %v399_v33 = vpop.xlane.xlu0 %398 }
 0x2d6   :  { %v441_v36 = vsub.f32 %v1484_v11, %v399_v33 }
 0x2d7   :  { %v455_v37 = vmul.f32 1.442695, %v439_v31 }
 0x2d8   :  { %v459_v41 = vmul.f32 1.442695, %v441_v36  ;;  %v402_v44 = vpop.xlane.xlu1 %401 }
 0x2d9   :  { %1181 = vpow2.f32 %v455_v37  ;;  %v442_v48 = vsub.f32 %v1486_v12, %v402_v44 }
 0x2da   :  { %1183 = vpow2.f32 %v459_v41 }
 0x2db   :  { %v461_v49 = vmul.f32 1.442695, %v442_v48 }
 0x2dc   :  { %v408_v52 = vpop.xlane.xlu1 %407 }
 0x2dd   :  { %1185 = vpow2.f32 %v461_v49  ;;  %v444_v3 = vsub.f32 %v1495_v20, %v408_v52 }
 0x2df   :  { %v1583_v53 = vpop.eup %1179  ;;  %v465_v57 = vmul.f32 1.442695, %v444_v3 }
 0x2e0   :  { %v405_v60 = vpop.xlane.xlu1 %404  ;;  %v490_v5 = vsel %vm64_vm0, %v1583_v53, 0.0 }
 0x2e1   :  { %1187 = vpow2.f32 %v465_v57  ;;  %v443_v11 = vsub.f32 %v1502_v26, %v405_v60  ;;  %491 = vadd.xlane.f32.xlu0 %v490_v5 }
 0x2e3   :  { %v1588_v63 = vpop.eup %1181  ;;  %v463_v12 = vmul.f32 1.442695, %v443_v11 }
 0x2e4   :  { %v414_v0 = vpop.xlane.xlu1 %413  ;;  %v487_v1 = vsel %vm64_vm0, %v1588_v63, 0.0  ;;  %v1592_v2 = vpop.eup %1183 }
 0x2e5   :  { %1189 = vpow2.f32 %v463_v12  ;;  %v446_v20 = vsub.f32 %v1512_v32, %v414_v0  ;;  %488 = vadd.xlane.f32.xlu1 %v487_v1  ;;  %v493_v26 = vsel %vm64_vm0, %v1592_v2, 0.0  ;;  %v426_v14 = vpop.xlane.xlu0 %425 }
 0x2e6   :  { %v450_v21 = vsub.f32 %v1519_v40, %v426_v14 }
 0x2e7   :  { %v1595_v6 = vpop.eup %1185  ;;  %v469_v8 = vmul.f32 1.442695, %v446_v20 }
 0x2e8   :  { %v411_v9 = vpop.xlane.xlu1 %410  ;;  %v496_v10 = vsel %vm64_vm0, %v1595_v6, 0.0 }
 0x2e9   :  { %v445_v16 = vsub.f32 %v1524_v45, %v411_v9  ;;  %494 = vadd.xlane.f32.xlu1 %v493_v26  ;;  %497 = vadd.xlane.f32.xlu0 %v496_v10  ;;  %1191 = vpow2.f32 %v469_v8  ;;  %v477_v45 = vmul.f32 1.442695, %v450_v21  ;;  %v432_v0 = vpop.xlane.xlu0 %431 }
 0x2ea   :  { %v452_v26 = vsub.f32 %v1533_v56, %v432_v0 }
 0x2eb   :  { %v1602_v18 = vpop.eup %1187  ;;  %v467_v32 = vmul.f32 1.442695, %v445_v16 }
 0x2ec   :  { %v420_v23 = vpop.xlane.xlu1 %419  ;;  %v502_v24 = vsel %vm64_vm0, %v1602_v18, 0.0 }
 0x2ed   :  { %v448_v27 = vsub.f32 %v1538_v61, %v420_v23  ;;  %503 = vadd.xlane.f32.xlu0 %v502_v24  ;;  %1193 = vpow2.f32 %v467_v32  ;;  %v438_v10 = vpop.xlane.xlu0 %437  ;;  %v481_v32 = vmul.f32 1.442695, %v452_v26 }
 0x2ee   :  { %v454_v14 = vsub.f32 %v1547_v4, %v438_v10 }
 0x2ef   :  { %v1608_v28 = vpop.eup %1189  ;;  %v473_v29 = vmul.f32 1.442695, %v448_v27 }
 0x2f0   :  { %v417_v30 = vpop.xlane.xlu1 %416  ;;  %v499_v31 = vsel %vm64_vm0, %v1608_v28, 0.0  ;;  %v485_v21 = vmul.f32 1.442695, %v454_v14 }
 0x2f1   :  { %v447_v33 = vsub.f32 %v1549_v7, %v417_v30  ;;  %500 = vadd.xlane.f32.xlu1 %v499_v31  ;;  %1195 = vpow2.f32 %v473_v29 }
 0x2f2   :  { %1197 = vpow2.f32 %v477_v45 }
 0x2f3   :  { %v471_v40 = vmul.f32 1.442695, %v447_v33  ;;  %v1613_v36 = vpop.eup %1191 }
 0x2f4   :  { %v423_v37 = vpop.xlane.xlu1 %422  ;;  %v508_v41 = vsel %vm64_vm0, %v1613_v36, 0.0 }
 0x2f5   :  { %1199 = vpow2.f32 %v471_v40  ;;  %v449_v61 = vsub.f32 %v1558_v13, %v423_v37  ;;  %509 = vadd.xlane.f32.xlu0 %v508_v41 }
 0x2f7   :  { %v475_v44 = vmul.f32 1.442695, %v449_v61  ;;  %v1618_v48 = vpop.eup %1193 }
 0x2f8   :  { %v505_v7 = vsel %vm64_vm0, %v1618_v48, 0.0  ;;  %v429_v12 = vpop.xlane.xlu1 %428 }
 0x2f9   :  { %1201 = vpow2.f32 %v475_v44  ;;  %506 = vadd.xlane.f32.xlu1 %v505_v7  ;;  %v451_v1 = vsub.f32 %v1565_v17, %v429_v12 }
 0x2fb   :  { %v1622_v49 = vpop.eup %1195  ;;  %v479_v8 = vmul.f32 1.442695, %v451_v1 }
 0x2fc   :  { %v514_v52 = vsel %vm64_vm0, %v1622_v49, 0.0  ;;  %v1626_v3 = vpop.eup %1197  ;;  %v435_v20 = vpop.xlane.xlu1 %434 }
 0x2fd   :  { %515 = vadd.xlane.f32.xlu0 %v514_v52  ;;  %v520_v60 = vsel %vm64_vm0, %v1626_v3, 0.0  ;;  %v453_v9 = vsub.f32 %v1572_v22, %v435_v20  ;;  %1203 = vpow2.f32 %v479_v8 }
 0x2ff   :  { %v1628_v13 = vpop.eup %1199  ;;  %v483_v16 = vmul.f32 1.442695, %v453_v9 }
 0x300   :  { %v511_v57 = vsel %vm64_vm0, %v1628_v13, 0.0 }
 0x301   :  { %512 = vadd.xlane.f32.xlu1 %v511_v57  ;;  %521 = vadd.xlane.f32.xlu0 %v520_v60  ;;  %1205 = vpow2.f32 %v483_v16 }
 0x302   :  { %1207 = vpow2.f32 %v481_v32 }
 0x303   :  { %v1634_v5 = vpop.eup %1201  ;;  %1209 = vpow2.f32 %v485_v21 }
 0x304   :  { %v517_v11 = vsel %vm64_vm0, %v1634_v5, 0.0 }
 0x305   :  { %518 = vadd.xlane.f32.xlu0 %v517_v11 }
 0x312   :  { %1170 = vrot.lane.b32.xlu1 %v1340_v19, %s1268_s2  ;;  %v1644_v19 = vpop.eup %1203 }
 0x313   :  { %v1648_v17 = vpop.eup %1205 }
 0x314   :  { %v1650_v22 = vpop.eup %1207  ;;  %v529_v56 = vsel %vm64_vm0, %v1648_v17, 0.0 }
 0x315   :  { %v1654_v4 = vpop.eup %1209  ;;  %v526_v23 = vsel %vm64_vm0, %v1650_v22, 0.0 }
 0x316   :  { %v532_v24 = vsel %vm64_vm0, %v1654_v4, 0.0 }
 0x31b   :  { %1175 = vrot.lane.b32.xlu0 %v1348_v25, %s1268_s2  ;;  %v523_v25 = vsel %vm64_vm0, %v1644_v19, 0.0 }
 0x336   :  { %524 = vadd.xlane.f32.xlu1 %v523_v25 }
 0x33a   :  { %530 = vadd.xlane.f32.xlu1 %v529_v56  ;;  %527 = vadd.xlane.f32.xlu0 %v526_v23 }
 0x33e   :  { %533 = vadd.xlane.f32.xlu1 %v532_v24 }
 0x36e   :  { %v492_v29 = vpop.xlane.xlu0 %491 }
 0x372   :  { %v489_v27 = vpop.xlane.xlu1 %488 }
 0x373   :  { %1211 = vrcp.f32 %v489_v27 }
 0x374   :  { %1213 = vrcp.f32 %v492_v29 }
 0x376   :  { %v498_v30 = vpop.xlane.xlu0 %497  ;;  %v495_v33 = vpop.xlane.xlu1 %494 }
 0x377   :  { %1215 = vrcp.f32 %v495_v33 }
 0x378   :  { %1217 = vrcp.f32 %v498_v30 }
 0x37a   :  { %v504_v40 = vpop.xlane.xlu0 %503 }
 0x37d   :  { %v1212_v45 = vpop.eup %1211 }
 0x37e   :  { %v551_v31 = vmul.f32 %v1212_v45, %v1588_v63  ;;  %v501_v37 = vpop.xlane.xlu1 %500  ;;  %v1214_v9 = vpop.eup %1213 }
 0x37f   :  { %1219 = vrcp.f32 %v501_v37  ;;  %v552_v10 = vmul.f32 %v1214_v9, %v1583_v53 }
 0x380   :  { %1076 = vmatprep.mubr.msk.f32.mxu0 %vm64_vm0, %v551_v31  ;;  %1221 = vrcp.f32 %v504_v40 }
 0x381   :  { %v1216_v26 = vpop.eup %1215 }
 0x382   :  { %v510_v61 = vpop.xlane.xlu0 %509  ;;  %v1218_v14 = vpop.eup %1217  ;;  %v553_v16 = vmul.f32 %v1216_v26, %v1592_v2 }
 0x383   :  { %v554_v21 = vmul.f32 %v1218_v14, %v1595_v6 }
 0x386   :  { %v507_v41 = vpop.xlane.xlu1 %506 }
 0x387   :  { %1223 = vrcp.f32 %v507_v41 }
 0x388   :  { %1225 = vrcp.f32 %v510_v61 }
 0x389   :  { %v1220_v32 = vpop.eup %1219 }
 0x38a   :  { %v516_v44 = vpop.xlane.xlu0 %515  ;;  %v1222_v25 = vpop.eup %1221  ;;  %v555_v56 = vmul.f32 %v1220_v32, %v1608_v28 }
 0x38b   :  { %v556_v53 = vmul.f32 %v1222_v25, %v1602_v18 }
 0x38e   :  { %v513_v7 = vpop.xlane.xlu1 %512  ;;  %v522_v52 = vpop.xlane.xlu0 %521 }
 0x38f   :  { %1227 = vrcp.f32 %v513_v7 }
 0x390   :  { %1229 = vrcp.f32 %v516_v44 }
 0x391   :  { %v1224_v23 = vpop.eup %1223 }
 0x392   :  { %v1171_v57 = vpop.permute.xlu1 %1170  ;;  %v519_v60 = vpop.xlane.xlu0 %518  ;;  %v557_v24 = vmul.f32 %v1224_v23, %v1618_v48 }
 0x393   :  { %v1173_v11 = vunpack.i.h.bf16 %v1171_v57  ;;  %v1172_v12 = vunpack.i.l.bf16 %v1171_v57  ;;  %1231 = vrcp.f32 %v519_v60  ;;  %v1226_v2 = vpop.eup %1225  ;;  %v30_v57 = vld [vmem:[%s1744_s1 + $0x58] sm:$0xff] }
 0x394   :  { %1233 = vrcp.f32 %v522_v52  ;;  %v558_v6 = vmul.f32 %v1226_v2, %v1613_v36  ;;  %v28_v52 = vld [vmem:[%s1744_s1 + $0x48] sm:$0xff] }
 0x395   :  { %v1134_v0 = vpack.c.bf16 %v1173_v11, %v1172_v12 }
 0x396   :  { %v1176_v63 = vpop.permute.xlu0 %1175 }
 0x397   :  { %1135 = vmatprep.subr.bf16.mxu0 %v1134_v0  ;;  %1150 = vmatprep.subr.bf16.mxu1 %v1134_v0  ;;  %v1178_v1 = vunpack.i.h.bf16 %v1176_v63  ;;  %v1177_v20 = vunpack.i.l.bf16 %v1176_v63 }
 0x398   :  { %1137 = vmatpush3.bf16.msra.mxu0 %v1134_v0  ;;  %1152 = vmatpush3.bf16.msra.mxu1 %v1134_v0 }
 0x399   :  { %v1138_v8 = vpack.c.bf16 %v1178_v1, %v1177_v20  ;;  %v1228_v27 = vpop.eup %1227 }
 0x39a   :  { %v1230_v29 = vpop.eup %1229  ;;  %v559_v28 = vmul.f32 %v1228_v27, %v1628_v13 }
 0x39b   :  { %1139 = vmatprep.subr.bf16.mxu0 %v1138_v8  ;;  %1151 = vmatprep.subr.bf16.mxu1 %v1138_v8  ;;  %v560_v18 = vmul.f32 %v1230_v29, %v1622_v49 }
 0x39c   :  { %1141 = vmatpush3.bf16.msra.mxu0 %v1138_v8  ;;  %1153 = vmatpush3.bf16.msra.mxu1 %v1138_v8 }
 0x39d   :  { %v1232_v45 = vpop.eup %1231 }
 0x39e   :  { %v1234_v30 = vpop.eup %1233  ;;  %v561_v48 = vmul.f32 %v1232_v45, %v1634_v5 }
 0x39f   :  { %1077 = vmatmul.mubr.msk.f32.vlgmr.msra.gmra.mrb[4].mxu0 %vm64_vm0, %v552_v10  ;;  %v562_v31 = vmul.f32 %v1234_v30, %v1626_v3 }
 0x3a0   :  { %1079 = vmatprep.mubr.msk.f32.mxu0 %vm64_vm0, %v553_v16 }
 0x3a3   :  { %1080 = vmatmul.mubr.msk.f32.gmra.mrb[6].mxu0 %vm64_vm0, %v554_v21 }
 0x3a4   :  { %1082 = vmatprep.mubr.msk.f32.mxu0 %vm64_vm0, %v555_v56 }
 0x3a7   :  { %1083 = vmatmul.mubr.msk.f32.gmra.mrb[8].mxu0 %vm64_vm0, %v556_v53 }
 0x3a8   :  { %1085 = vmatprep.mubr.msk.f32.mxu0 %vm64_vm0, %v557_v24 }
 0x3ab   :  { %1086 = vmatmul.mubr.msk.f32.gmra.mrb[10].mxu0 %vm64_vm0, %v558_v6 }
 0x3ac   :  { %1088 = vmatprep.mubr.msk.f32.mxu0 %vm64_vm0, %v559_v28 }
 0x3af   :  { %1089 = vmatmul.mubr.msk.f32.gmra.mrb[12].mxu0 %vm64_vm0, %v560_v18 }
 0x3b0   :  { %1091 = vmatprep.mubr.msk.f32.mxu0 %vm64_vm0, %v561_v48 }
 0x3b3   :  { %1092 = vmatmul.mubr.msk.f32.gmra.mrb[14].mxu0 %vm64_vm0, %v562_v31 }
 0x3c3   :  { %v525_v36 = vpop.xlane.xlu1 %524 }
 0x3c4   :  { %1235 = vrcp.f32 %v525_v36 }
 0x3c7   :  { %v531_v13 = vpop.xlane.xlu1 %530  ;;  %v528_v33 = vpop.xlane.xlu0 %527 }
 0x3c8   :  { %1237 = vrcp.f32 %v531_v13 }
 0x3c9   :  { %1239 = vrcp.f32 %v528_v33 }
 0x3cb   :  { %v534_v40 = vpop.xlane.xlu1 %533 }
 0x3cc   :  { %1241 = vrcp.f32 %v534_v40 }
 0x3ce   :  { %v1236_v49 = vpop.eup %1235 }
 0x3cf   :  { %v563_v37 = vmul.f32 %v1236_v49, %v1644_v19  ;;  %v27_v19 = vld [vmem:[%s1744_s1 + $0x40] sm:$0xff] }
 0x3d1   :  { %1094 = vmatprep.mubr.msk.f32.mxu0 %vm64_vm0, %v563_v37 }
 0x3d2   :  { %v1238_v5 = vpop.eup %1237 }
 0x3d3   :  { %v1240_v61 = vpop.eup %1239  ;;  %v565_v41 = vmul.f32 %v1238_v5, %v1648_v17  ;;  %v29_v17 = vld [vmem:[%s1744_s1 + $0x50] sm:$0xff] }
 0x3d4   :  { %v564_v3 = vmul.f32 %v1240_v61, %v1650_v22  ;;  %v1142_v22 = vpack.c.bf16 %v28_v52, %v27_v19 }
 0x3d5   :  { %1097 = vmatprep.mubr.msk.f32.mxu1 %vm64_vm0, %v565_v41 }
 0x3d6   :  { %v1242_v44 = vpop.eup %1241  ;;  %1095 = vmatmul.mubr.msk.f32.gmra.mrb[16].mxu0 %vm64_vm0, %v564_v3  ;;  %1143 = vmatprep.subr.bf16.mxu0 %v1142_v22 }
 0x3d7   :  { %v566_v7 = vmul.f32 %v1242_v44, %v1654_v4  ;;  %v1146_v4 = vpack.c.bf16 %v30_v57, %v29_v17  ;;  %1145 = vmatpush3.bf16.msra.mxu0 %v1142_v22 }
 0x3d9   :  { %1098 = vmatmul.mubr.msk.f32.vlgmr.msra.gmra.mrb[16].mxu1 %vm64_vm0, %v566_v7  ;;  %1147 = vmatprep.subr.bf16.mxu0 %v1146_v4 }
 0x3db   :  { %1149 = vmatpush3.bf16.msra.mxu0 %v1146_v4 }
 0x472   :  { %v1078_v60 = vpop.f32.mrb[4].mxu0 }
 0x473   :  { %v693_v11 = vpop.f32.mrb[5].mxu0  ;;  %v773_v1 = vmul.f32 %v1078_v60, %v1356_v34 }
 0x474   :  { %v772_v9 = vmul.f32 %v693_v11, %v1331_v15 }
 0x476   :  { %v1081_v12 = vpop.f32.mrb[6].mxu0 }
 0x477   :  { %v703_v0 = vpop.f32.mrb[7].mxu0  ;;  %v775_v32 = vmul.f32 %v1081_v12, %v1369_v38 }
 0x478   :  { %v774_v56 = vmul.f32 %v703_v0, %v1361_v35 }
 0x47a   :  { %v1084_v63 = vpop.f32.mrb[8].mxu0 }
 0x47b   :  { %v777_v20 = vmul.f32 %v1084_v63, %v1384_v42  ;;  %v713_v8 = vpop.f32.mrb[9].mxu0 }
 0x47c   :  { %v776_v26 = vmul.f32 %v713_v8, %v1375_v39 }
 0x47d   :  { %v789_v10 = vadd.f32 %v777_v20, %v773_v1 }
 0x47e   :  { %v788_v14 = vadd.f32 %v776_v26, %v772_v9  ;;  %v1087_v16 = vpop.f32.mrb[10].mxu0 }
 0x47f   :  { %v779_v21 = vmul.f32 %v1087_v16, %v1399_v46  ;;  %v723_v25 = vpop.f32.mrb[11].mxu0 }
 0x480   :  { %v778_v23 = vmul.f32 %v723_v25, %v1390_v43 }
 0x481   :  { %v791_v34 = vadd.f32 %v779_v21, %v775_v32 }
 0x482   :  { %v790_v53 = vadd.f32 %v778_v23, %v774_v56  ;;  %v1090_v42 = vpop.f32.mrb[12].mxu0 }
 0x483   :  { %v781_v2 = vmul.f32 %v1090_v42, %v1414_v50  ;;  %v733_v15 = vpop.f32.mrb[13].mxu0 }
 0x484   :  { %v780_v39 = vmul.f32 %v733_v15, %v1405_v47 }
 0x485   :  { %v793_v24 = vadd.f32 %v789_v10, %v781_v2 }
 0x486   :  { %v792_v27 = vadd.f32 %v788_v14, %v780_v39  ;;  %v1093_v6 = vpop.f32.mrb[14].mxu0 }
 0x487   :  { %v783_v38 = vmul.f32 %v1093_v6, %v1429_v54  ;;  %v743_v29 = vpop.f32.mrb[15].mxu0 }
 0x488   :  { %v782_v46 = vmul.f32 %v743_v29, %v1420_v51 }
 0x489   :  { %v795_v28 = vadd.f32 %v791_v34, %v783_v38 }
 0x48a   :  { %v794_v35 = vadd.f32 %v790_v53, %v782_v46 }
 0x4a9   :  { %v1096_v45 = vpop.f32.mrb[16].mxu0 }
 0x4aa   :  { %v785_v43 = vmul.f32 %v1096_v45, %v1444_v58  ;;  %v753_v18 = vpop.f32.mrb[17].mxu0 }
 0x4ab   :  { %v784_v30 = vmul.f32 %v753_v18, %v1435_v55  ;;  %v961_v55 = vld [vmem:[%s1744_s1 + $0x60] ss:$0 sm:$0xff]  ;;  %s1243_s1 = scalar_lea.vmem %s911_s28, 512 }
 0x4ac   :  { %v797_v50 = vadd.f32 %v793_v24, %v785_v43  ;;  %v1099_v48 = vpop.f32.mrb[16].mxu1  ;;  %p1244_p0 = scmp.ne.s32.totalorder %s911_s28, %s1243_s1  ;;  %p1249_p2 = scmp.lt.s32.totalorder %s1243_s1, %s1243_s1 }
 0x4ad   :  { %v796_v31 = vadd.f32 %v792_v27, %v784_v30  ;;  %v787_v47 = vmul.f32 %v1099_v48, %v1459_v62  ;;  %v763_v36 = vpop.f32.mrb[17].mxu1 }
 0x4ae   :  { %v786_v13 = vmul.f32 %v763_v36, %v1450_v59  ;;  %p1250_p3 = por %p1249_p2, %p1248_p1 }
 0x4af   :  { %v799_v54 = vadd.f32 %v795_v28, %v787_v47  ;;  %1108 = vmatprep.mubr.msk.f32.mxu0 %vm64_vm0, %v796_v31 }
 0x4b0   :  { %v798_v51 = vadd.f32 %v794_v35, %v786_v13  ;;  %1109 = vmatmul.mubr.msk.f32.vlgmr.msra.gmra.mrb[18].mxu0 %vm64_vm0, %v797_v50  ;;  %p1251_p4 = pnand %p1250_p3, %p1244_p0 }
 0x4b2   :  { %1111 = vmatprep.mubr.msk.f32.mxu0 %vm64_vm0, %v798_v51 }
 0x4b4   :  { %1112 = vmatmul.mubr.msk.f32.gmra.mrb[20].mxu0 %vm64_vm0, %v799_v54 }
 0x583   :  { %v1110_v58 = vpop.f32.mrb[18].mxu0 }
 0x584   :  { %v888_v33 = vadd.f32 %v1110_v58, %v961_v55  ;;  %v882_v62 = vpop.f32.mrb[19].mxu0 }
 0x585   :  { %v883_v40 = vadd.f32 %v961_v55, %v882_v62 }
 0x586   :  { %902 = vst.msk [vmem:[#allocation2 + $0x8] sm:$0xff] %vm64_vm0, %v888_v33 }
 0x587   :  { %901 = vst.msk [vmem:[#allocation2] sm:$0xff] %vm64_vm0, %v883_v40  ;;  %v1113_v59 = vpop.f32.mrb[20].mxu0 }
 0x588   :  { %v898_v49 = vadd.f32 %v1113_v59, %v961_v55  ;;  %v892_v37 = vpop.f32.mrb[21].mxu0 }
 0x589   :  { %v893_v5 = vadd.f32 %v961_v55, %v892_v37 }
 0x58a   :  { %904 = vst.msk [vmem:[#allocation2 + $0x18] sm:$0xff] %vm64_vm0, %v898_v49 }
 0x58b   :  { %903 = vst.msk [vmem:[#allocation2 + $0x10] sm:$0xff] %vm64_vm0, %v893_v5 }
 0x58c   :  { %1254 = shalt.err (!%p1251_p4)
}
 0x58d   :  { %s1255_s4 = scalar_lea.hbm %s1746_s3, 512 }
 0x58e   :  { %p1256_p5 = scmp.ne.s32.totalorder %s1746_s3, %s1255_s4  ;;  %p1259_p6 = scmp.lt.u32.totalorder %s1255_s4, %s1746_s3 }
 0x590   :  { %p1261_p7 = pnand %p1259_p6, %p1256_p5 }
 0x592   :  { %1264 = shalt.err (!%p1261_p7)
}
 0x593   :  { %s1270_s8 = smov 128   ;;  %s1271_s9 = smov 8  }
 0x594   :  { %916 = dma.vmem_to_hbm [thread:$0]  %s911_s28, 512, %s1746_s3, [#allocation3], %s1270_s8, %s1270_s8, %s1271_s9  }
 0x595   :  { %1265 = dma.done.wait [#allocation3], 512  }
 0x596   :  { %1266 = vsyncadd [#allocation3], 4294966784 }
 0x597   :  { %920 = vsyncpa [#allocation3], 1 }

</bundles_post_ra>
